<compile_context>
chip_gen: v7x
topology: tpu7x:2x2x1
jax: 0.10.0
libtpu: 0.0.40
codegen_flags: <defaults>
</compile_context>

<pallas_src>
import jax
import jax.numpy as jnp
from jax.experimental import pallas as pl
from jax.experimental.pallas import tpu as pltpu

_INV_SQRT2 = 0.7071067811865476


def _gelu_erf(y):
    # Exact GELU (matches torch.nn.functional.gelu default, erf-based).
    return 0.5 * y * (1.0 + jax.lax.erf(y * _INV_SQRT2))


# -------- Case A: W fully VMEM-resident, grid over M only, no reduction axis.
def _fused_small_kernel(x_ref, w_ref, b_ref, o_ref):
    y = jnp.dot(x_ref[...], w_ref[...], preferred_element_type=jnp.float32)
    y = y + b_ref[...].astype(jnp.float32)
    o_ref[...] = _gelu_erf(y).astype(o_ref.dtype)


# -------- Case B: 3-D tiled matmul, f32 output accumulates in place.
def _tiled_kernel_f32out(x_ref, w_ref, b_ref, o_ref):
    k = pl.program_id(2)

    @pl.when(k == 0)
    def _init():
        o_ref[...] = jnp.zeros_like(o_ref)

    o_ref[...] += jnp.dot(x_ref[...], w_ref[...],
                          preferred_element_type=jnp.float32)

    @pl.when(k == pl.num_programs(2) - 1)
    def _finalize():
        y = o_ref[...] + b_ref[...].astype(jnp.float32)
        o_ref[...] = _gelu_erf(y)


# -------- Case B (non-f32 output): keep an f32 VMEM accumulator.
def _tiled_kernel_scratch(x_ref, w_ref, b_ref, o_ref, acc_ref):
    k = pl.program_id(2)

    @pl.when(k == 0)
    def _init():
        acc_ref[...] = jnp.zeros_like(acc_ref)

    acc_ref[...] += jnp.dot(x_ref[...], w_ref[...],
                            preferred_element_type=jnp.float32)

    @pl.when(k == pl.num_programs(2) - 1)
    def _finalize():
        y = acc_ref[...] + b_ref[...].astype(jnp.float32)
        o_ref[...] = _gelu_erf(y).astype(o_ref.dtype)


def linear_gelu(x, w, b, *, tm=256, tn=256, tk=512,
                small_w_bytes=4 << 20, small_vmem_bytes=24 << 20):
    """gelu(x @ w + b), x: (..., dim_in), w: (dim_in, dim_out), b: (dim_out,).

    `w` is the torch nn.Linear weight already transposed to (in, out).
    Leading dims of x are flattened into the token/M axis.
    """
    *lead, din = x.shape
    dout = w.shape[1]
    M = 1
    for d in lead:
        M *= d
    x2 = x.reshape(M, din)
    b2 = b.reshape(1, dout)
    isz = jnp.dtype(x.dtype).itemsize
    w_bytes = din * dout * jnp.dtype(w.dtype).itemsize

    # ------------------------------------------------------------------
    # Case A: keep W (and bias) fully VMEM-resident; grid over M only.
    # ------------------------------------------------------------------
    Mp8 = pl.cdiv(M, 8) * 8
    if M <= tm:
        tm_a, Mp = Mp8, Mp8
    else:
        tm_a = tm
        Mp = pl.cdiv(M, tm_a) * tm_a
    est_a = (2 * tm_a * din * isz          # double-buffered x tile
             + 2 * w_bytes                 # weight (constant index, 2x conservative)
             + 2 * dout * jnp.dtype(b.dtype).itemsize
             + 2 * tm_a * dout * isz)      # double-buffered out tile

    if w_bytes <= small_w_bytes and est_a <= small_vmem_bytes:
        xp = x2 if Mp == M else jnp.pad(x2, ((0, Mp - M), (0, 0)))
        out = pl.pallas_call(
            _fused_small_kernel,
            out_shape=jax.ShapeDtypeStruct((Mp, dout), x.dtype),
            grid_spec=pltpu.PrefetchScalarGridSpec(
                num_scalar_prefetch=0,
                grid=(Mp // tm_a,),
                in_specs=[
                    pl.BlockSpec((tm_a, din), lambda i: (i, 0)),   # activations
                    pl.BlockSpec((din, dout), lambda i: (0, 0)),   # W: resident
                    pl.BlockSpec((1, dout), lambda i: (0, 0)),     # bias: resident
                ],
                out_specs=pl.BlockSpec((tm_a, dout), lambda i: (i, 0)),
            ),
            compiler_params=pltpu.CompilerParams(
                dimension_semantics=("parallel",),
                vmem_limit_bytes=int(max(2 * est_a, 32 << 20)),
            ),
        )(xp, w, b2)
        if Mp != M:
            out = out[:M]
        return out.reshape(*lead, dout)

    # ------------------------------------------------------------------
    # Case B: general tiled matmul with fused bias + GELU epilogue.
    # ------------------------------------------------------------------
    def _clamp(t, d, unit):
        return min(t, pl.cdiv(d, unit) * unit)

    tm_b = _clamp(tm, M, 8)
    tk_b = _clamp(tk, din, 128)
    tn_b = _clamp(tn, dout, 128)
    Mp = pl.cdiv(M, tm_b) * tm_b
    Kp = pl.cdiv(din, tk_b) * tk_b
    Np = pl.cdiv(dout, tn_b) * tn_b

    xp = x2 if (Mp == M and Kp == din) else jnp.pad(
        x2, ((0, Mp - M), (0, Kp - din)))
    wp = w if (Kp == din and Np == dout) else jnp.pad(
        w, ((0, Kp - din), (0, Np - dout)))
    bp = b2 if Np == dout else jnp.pad(b2, ((0, 0), (0, Np - dout)))

    if x.dtype == jnp.float32:
        kernel = _tiled_kernel_f32out
        scratch = []
        acc_bytes = 0
    else:
        kernel = _tiled_kernel_scratch
        scratch = [pltpu.VMEM((tm_b, tn_b), jnp.float32)]
        acc_bytes = tm_b * tn_b * 4

    est_b = (2 * (tm_b * tk_b + tk_b * tn_b + tn_b + tm_b * tn_b) * isz
             + acc_bytes)
    # Stay well under v7x's 64 MiB physical VMEM; lift above the 16/32 MiB
    # scoped defaults on v5e/v6e when the tiling needs it.
    vmem_limit = int(min(max(2 * est_b, 32 << 20), 48 << 20))

    out = pl.pallas_call(
        kernel,
        out_shape=jax.ShapeDtypeStruct((Mp, Np), x.dtype),
        grid_spec=pltpu.PrefetchScalarGridSpec(
            num_scalar_prefetch=0,
            grid=(Mp // tm_b, Np // tn_b, Kp // tk_b),
            in_specs=[
                pl.BlockSpec((tm_b, tk_b), lambda i, j, k: (i, k)),  # activations
                pl.BlockSpec((tk_b, tn_b), lambda i, j, k: (k, j)),  # weight
                pl.BlockSpec((1, tn_b), lambda i, j, k: (0, j)),     # bias
            ],
            out_specs=pl.BlockSpec((tm_b, tn_b), lambda i, j, k: (i, j)),
            scratch_shapes=scratch,
        ),
        compiler_params=pltpu.CompilerParams(
            dimension_semantics=("parallel", "parallel", "arbitrary"),
            vmem_limit_bytes=vmem_limit,
        ),
    )(xp, wp, bp)

    if Mp != M or Np != dout:
        out = out[:M, :dout]
    return out.reshape(*lead, dout)


def reference(x, w, b):
    return jax.nn.gelu(jnp.dot(x, w) + b, approximate=False)


if __name__ == "__main__":
    key = jax.random.PRNGKey(0)

    # --- Main test: shapes consistent with the module (B, seq, dim_in). ---
    B, S = 2, 64
    dim_in, dim_out = 256, 512
    kx, kw, kb = jax.random.split(key, 3)
    x = jax.random.normal(kx, (B, S, dim_in), jnp.float32)
    # torch nn.Linear weight is (out, in); stored pre-transposed to (in, out).
    w = jax.random.normal(kw, (dim_in, dim_out), jnp.float32) * dim_in ** -0.5
    b = jax.random.normal(kb, (dim_out,), jnp.float32) * 0.01

    out = jax.block_until_ready(linear_gelu(x, w, b))
    ref = jax.block_until_ready(reference(x, w, b))
    assert out.shape == (B, S, dim_out)
    assert jnp.allclose(out, ref, rtol=1e-3, atol=1e-3), "mismatch (small path)"

    # --- Also exercise the general tiled (Case B) path on the same data. ---
    out_b = jax.block_until_ready(linear_gelu(x, w, b, small_w_bytes=0))
    assert jnp.allclose(out_b, ref, rtol=1e-3, atol=1e-3), "mismatch (tiled path)"

    # --- Ragged-M case (non-multiple-of-8 token count) through Case A. ---
    S2 = 33
    x2 = jax.random.normal(kx, (B, S2, dim_in), jnp.float32)
    out_r = jax.block_until_ready(linear_gelu(x2, w, b))
    ref_r = jax.block_until_ready(reference(x2, w, b))
    assert out_r.shape == (B, S2, dim_out)
    assert jnp.allclose(out_r, ref_r, rtol=1e-3, atol=1e-3), "mismatch (ragged M)"

    print("KERNEL_OK")
</pallas_src>

<mosaic_0001>
module attributes {stable_mosaic.version = 11 : i64} {
  func.func @_fused_small_kernel(%arg0: i32, %arg1: memref<128x256xf32, #tpu.memory_space<vmem>>, %arg2: memref<256x512xf32, #tpu.memory_space<vmem>>, %arg3: memref<1x512xf32, #tpu.memory_space<vmem>>, %arg4: memref<128x512xf32, #tpu.memory_space<vmem>>) attributes {dimension_semantics = [#tpu.dimension_semantics<parallel>], iteration_bounds = array<i64: 1>, scalar_prefetch = 0 : i64, scratch_operands = 0 : i64, tpu.core_type = #tpu.core_type<tc>, window_params = [{transform_indices = @transform_0, window_bounds = array<i64: 128, 256>}, {pipeline_mode = #tpu.pipeline_mode<synchronous>, transform_indices = @transform_1, window_bounds = array<i64: 256, 512>}, {pipeline_mode = #tpu.pipeline_mode<synchronous>, transform_indices = @transform_2, window_bounds = array<i64: 1, 512>}, {transform_indices = @transform_3, window_bounds = array<i64: 128, 512>}]} {
    %c0 = arith.constant 0 : index
    %c0_0 = arith.constant 0 : index
    %0 = vector.load %arg1[%c0, %c0_0] : memref<128x256xf32, #tpu.memory_space<vmem>>, vector<128x256xf32>
    %c0_1 = arith.constant 0 : index
    %c0_2 = arith.constant 0 : index
    %1 = vector.load %arg2[%c0_1, %c0_2] : memref<256x512xf32, #tpu.memory_space<vmem>>, vector<256x512xf32>
    %cst = arith.constant dense<0.000000e+00> : vector<128x512xf32>
    %2 = tpu.matmul %0, %1, %cst {dimension_numbers = #tpu.dot_dimension_numbers<[1], [0], [0], [1], [0, 0, 1, 1], [], []>} : vector<128x256xf32>, vector<256x512xf32>, vector<128x512xf32> -> vector<128x512xf32>
    %c0_3 = arith.constant 0 : index
    %c0_4 = arith.constant 0 : index
    %3 = vector.load %arg3[%c0_3, %c0_4] : memref<1x512xf32, #tpu.memory_space<vmem>>, vector<1x512xf32>
    %4 = vector.broadcast %3 : vector<1x512xf32> to vector<128x512xf32>
    %5 = arith.addf %2, %4 : vector<128x512xf32>
    %cst_5 = arith.constant 5.000000e-01 : f32
    %6 = vector.broadcast %cst_5 : f32 to vector<128x512xf32>
    %7 = arith.mulf %6, %5 : vector<128x512xf32>
    %cst_6 = arith.constant 0.707106769 : f32
    %8 = vector.broadcast %cst_6 : f32 to vector<128x512xf32>
    %9 = arith.mulf %5, %8 : vector<128x512xf32>
    %10 = math.erf %9 : vector<128x512xf32>
    %cst_7 = arith.constant 1.000000e+00 : f32
    %11 = vector.broadcast %cst_7 : f32 to vector<128x512xf32>
    %12 = arith.addf %11, %10 : vector<128x512xf32>
    %13 = arith.mulf %7, %12 : vector<128x512xf32>
    %c0_8 = arith.constant 0 : index
    %c0_9 = arith.constant 0 : index
    %14 = vector.load %arg4[%c0_8, %c0_9] : memref<128x512xf32, #tpu.memory_space<vmem>>, vector<128x512xf32>
    tpu.vector_store %arg4[%c0_8, %c0_9], %13 {strides = array<i32>} : memref<128x512xf32, #tpu.memory_space<vmem>>, vector<128x512xf32>,
    return
  }
  func.func @transform_0(%arg0: i32) -> (i32, i32) {
    %c0_i32 = arith.constant 0 : i32
    %c0_i32_0 = arith.constant 0 : i32
    return %arg0, %c0_i32 : i32, i32
  }
  func.func @transform_1(%arg0: i32) -> (i32, i32) {
    %c0_i32 = arith.constant 0 : i32
    %c0_i32_0 = arith.constant 0 : i32
    %c0_i32_1 = arith.constant 0 : i32
    return %c0_i32, %c0_i32_0 : i32, i32
  }
  func.func @transform_2(%arg0: i32) -> (i32, i32) {
    %c0_i32 = arith.constant 0 : i32
    %c0_i32_0 = arith.constant 0 : i32
    %c0_i32_1 = arith.constant 0 : i32
    return %c0_i32, %c0_i32_0 : i32, i32
  }
  func.func @transform_3(%arg0: i32) -> (i32, i32) {
    %c0_i32 = arith.constant 0 : i32
    %c0_i32_0 = arith.constant 0 : i32
    return %arg0, %c0_i32 : i32, i32
  }
}

</mosaic_0001>

<bundles_post_ra>
// kernel: tpu_custom_call.1
= control target key start
LH: loop header
LB: loop body
LE: loop exit
PB: predicated region body
PF: predicated region fallthrough
CT: control target
= control target key end

     0   :  { %8 = vsyncpa [#allocation3], 0  ;;  %s1760_s0 = inlined_call_operand.hbm [shape: f32[128,256], index: 0, kind: input, shape index: {}]   ;;  %s1761_s1 = inlined_call_operand.hbm [shape: f32[256,512], index: 1, kind: input, shape index: {}]   ;;  %s1762_s2 = inlined_call_operand.vmem [shape: f32[1,512], index: 2, kind: input, shape index: {}]   ;;  %s1763_s3 = inlined_call_operand.hbm [shape: f32[128,512], index: 3, kind: output, shape index: {}]  }
   0x1   :  { %9 = vsyncpa [#allocation6], 0 }
   0x2   :  { %10 = vsyncpa [#allocation4], 0  ;;  %s1284_s12 = smov [#allocation2]   ;;  %s1212_s16 = scalar_lea.hbm %s1760_s0, 4096 }
   0x3   :  { %s16_s13 = sshll.u32 %s1284_s12, 4  ;;  %p1213_p0 = scmp.ne.s32.totalorder %s1760_s0, %s1212_s16  ;;  %s17_s13 = int_to_ptr.vmem [resolvable:$true] %s16_s13 }
   0x4   :  { %p1216_p1 = scmp.lt.u32.totalorder %s1212_s16, %s1760_s0 }
   0x6   :  { %p1218_p2 = pnand %p1216_p1, %p1213_p0 }
   0x8   :  { %1221 = shalt.err (!%p1218_p2)
}
   0x9   :  { %s1222_s21 = scalar_lea.vmem %s17_s13, 4096  ;;  %p1227_p4 = scmp.lt.s32.totalorder %s17_s13, %s17_s13 }
   0xa   :  { %p1223_p3 = scmp.ne.s32.totalorder %s17_s13, %s1222_s21  ;;  %p1228_p5 = scmp.lt.s32.totalorder %s1222_s21, %s1222_s21 }
   0xc   :  { %p1229_p6 = por %p1228_p5, %p1227_p4 }
   0xe   :  { %p1230_p7 = pnand %p1229_p6, %p1223_p3 }
  0x10   :  { %1233 = shalt.err (!%p1230_p7)
}
  0x11   :  { %s1285_s22 = smov 256   ;;  %s1286_s23 = smov 16  }
  0x12   :  { %22 = dma.hbm_to_vmem [thread:$0]  %s1760_s0, 4096, %s17_s13, [#allocation3], %s1285_s22, %s1285_s22, %s1286_s23  }
  0x13   :  { %s1287_s26 = smov [#allocation5]   ;;  %s1234_s30 = scalar_lea.hbm %s1761_s1, 16384 }
  0x14   :  { %s28_s27 = sshll.u32 %s1287_s26, 4  ;;  %p1235_p8 = scmp.ne.s32.totalorder %s1761_s1, %s1234_s30  ;;  %s29_s27 = int_to_ptr.vmem [resolvable:$true] %s28_s27 }
  0x15   :  { %p1238_p9 = scmp.lt.u32.totalorder %s1234_s30, %s1761_s1 }
  0x17   :  { %p1240_p10 = pnand %p1238_p9, %p1235_p8 }
  0x19   :  { %1243 = shalt.err (!%p1240_p10)
}
  0x1a   :  { %s1244_s8 = scalar_lea.vmem %s29_s27, 16384  ;;  %p1249_p12 = scmp.lt.s32.totalorder %s29_s27, %s29_s27 }
  0x1b   :  { %p1245_p11 = scmp.ne.s32.totalorder %s29_s27, %s1244_s8  ;;  %p1250_p13 = scmp.lt.s32.totalorder %s1244_s8, %s1244_s8 }
  0x1d   :  { %p1251_p0 = por %p1250_p13, %p1249_p12 }
  0x1f   :  { %p1252_p1 = pnand %p1251_p0, %p1245_p11 }
  0x21   :  { %1255 = shalt.err (!%p1252_p1)
}
  0x22   :  { %s1288_s0 = smov 512   ;;  %s1289_s9 = smov 32  }
  0x23   :  { %34 = dma.hbm_to_vmem [thread:$0]  %s1761_s1, 16384, %s29_s27, [#allocation6], %s1288_s0, %s1288_s0, %s1289_s9  }
  0x24   :  { %1278 = dma.done.wait [#allocation3], 4096  }
  0x25   :  { %1279 = vsyncadd [#allocation3], 4294963200 }
  0x26   :  { %1280 = dma.done.wait [#allocation6], 16384  }
  0x27   :  { %1281 = vsyncadd [#allocation6], 4294950912  ;;  %v76_v0 = vld [vmem:[#allocation5 + $0x8] sm:$0xff]  ;;  %v78_v2 = vld [vmem:[#allocation5 + $0x18] sm:$0xff] }
  0x28   :  { %v80_v1 = vld [vmem:[#allocation5 + $0x28] sm:$0xff]  ;;  %v82_v4 = vld [vmem:[#allocation5 + $0x38] sm:$0xff]  ;;  %v75_v5 = vld [vmem:[#allocation5] sm:$0xff] }
  0x29   :  { %v949_v3 = vpack.c.bf16 %v80_v1, %v76_v0  ;;  %v79_v6 = vld [vmem:[#allocation5 + $0x20] sm:$0xff]  ;;  %v1013_v7 = vpack.c.bf16 %v82_v4, %v78_v2  ;;  %v77_v9 = vld [vmem:[#allocation5 + $0x10] sm:$0xff]  ;;  %v84_v11 = vld [vmem:[#allocation5 + $0x48] sm:$0xff] }
  0x2a   :  { %v951_v8 = vpack.c.bf16 %v79_v6, %v75_v5  ;;  %v81_v10 = vld [vmem:[#allocation5 + $0x30] sm:$0xff]  ;;  %v88_v13 = vld [vmem:[#allocation5 + $0x68] sm:$0xff]  ;;  %v86_v14 = vld [vmem:[#allocation5 + $0x58] sm:$0xff] }
  0x2b   :  { %950 = vmatprep.subr.bf16.mxu0 %v949_v3  ;;  %v1015_v12 = vpack.c.bf16 %v81_v10, %v77_v9  ;;  %v90_v15 = vld [vmem:[#allocation5 + $0x78] sm:$0xff]  ;;  %1014 = vmatprep.subr.bf16.mxu1 %v1013_v7  ;;  %v953_v16 = vpack.c.bf16 %v88_v13, %v84_v11  ;;  %v83_v18 = vld [vmem:[#allocation5 + $0x40] sm:$0xff]  ;;  %v85_v20 = vld [vmem:[#allocation5 + $0x50] sm:$0xff] }
  0x2c   :  { %952 = vmatpush1.bf16.msra.mxu0 %v951_v8  ;;  %v1017_v17 = vpack.c.bf16 %v90_v15, %v86_v14  ;;  %v87_v19 = vld [vmem:[#allocation5 + $0x60] sm:$0xff]  ;;  %v89_v22 = vld [vmem:[#allocation5 + $0x70] sm:$0xff]  ;;  %v92_v23 = vld [vmem:[#allocation5 + $0x88] sm:$0xff] }
  0x2d   :  { %1016 = vmatpush1.bf16.msra.mxu1 %v1015_v12  ;;  %v955_v21 = vpack.c.bf16 %v87_v19, %v83_v18  ;;  %v96_v24 = vld [vmem:[#allocation5 + $0xa8] sm:$0xff]  ;;  %954 = vmatprep.subr.bf16.mxu0 %v953_v16  ;;  %v1019_v25 = vpack.c.bf16 %v89_v22, %v85_v20  ;;  %v94_v27 = vld [vmem:[#allocation5 + $0x98] sm:$0xff]  ;;  %v91_v29 = vld [vmem:[#allocation5 + $0x80] sm:$0xff] }
  0x2e   :  { %1018 = vmatprep.subr.bf16.mxu1 %v1017_v17  ;;  %v957_v26 = vpack.c.bf16 %v96_v24, %v92_v23  ;;  %v98_v28 = vld [vmem:[#allocation5 + $0xb8] sm:$0xff]  ;;  %v95_v31 = vld [vmem:[#allocation5 + $0xa0] sm:$0xff]  ;;  %v93_v32 = vld [vmem:[#allocation5 + $0x90] sm:$0xff] }
  0x2f   :  { %v1021_v30 = vpack.c.bf16 %v98_v28, %v94_v27  ;;  %v97_v33 = vld [vmem:[#allocation5 + $0xb0] sm:$0xff]  ;;  %v959_v34 = vpack.c.bf16 %v95_v31, %v91_v29  ;;  %v100_v35 = vld [vmem:[#allocation5 + $0xc8] sm:$0xff]  ;;  %v102_v37 = vld [vmem:[#allocation5 + $0xd8] sm:$0xff] }
  0x30   :  { %956 = vmatpush1.bf16.msra.mxu0 %v955_v21  ;;  %v104_v36 = vld [vmem:[#allocation5 + $0xe8] sm:$0xff]  ;;  %v1023_v38 = vpack.c.bf16 %v97_v33, %v93_v32  ;;  %v106_v40 = vld [vmem:[#allocation5 + $0xf8] sm:$0xff]  ;;  %v99_v41 = vld [vmem:[#allocation5 + $0xc0] sm:$0xff] }
  0x31   :  { %1020 = vmatpush1.bf16.msra.mxu1 %v1019_v25  ;;  %958 = vmatprep.subr.bf16.mxu0 %v957_v26  ;;  %v961_v39 = vpack.c.bf16 %v104_v36, %v100_v35  ;;  %v103_v42 = vld [vmem:[#allocation5 + $0xe0] sm:$0xff]  ;;  %v1025_v43 = vpack.c.bf16 %v106_v40, %v102_v37  ;;  %v101_v44 = vld [vmem:[#allocation5 + $0xd0] sm:$0xff]  ;;  %v108_v46 = vld [vmem:[#allocation5 + $0x108] sm:$0xff] }
  0x32   :  { %1022 = vmatprep.subr.bf16.mxu1 %v1021_v30  ;;  %v105_v45 = vld [vmem:[#allocation5 + $0xf0] sm:$0xff]  ;;  %v112_v47 = vld [vmem:[#allocation5 + $0x128] sm:$0xff]  ;;  %v110_v48 = vld [vmem:[#allocation5 + $0x118] sm:$0xff]  ;;  %v963_v50 = vpack.c.bf16 %v103_v42, %v99_v41 }
  0x33   :  { %v114_v49 = vld [vmem:[#allocation5 + $0x138] sm:$0xff]  ;;  %v1027_v51 = vpack.c.bf16 %v105_v45, %v101_v44  ;;  %v965_v52 = vpack.c.bf16 %v112_v47, %v108_v46  ;;  %v107_v53 = vld [vmem:[#allocation5 + $0x100] sm:$0xff]  ;;  %v109_v55 = vld [vmem:[#allocation5 + $0x110] sm:$0xff] }
  0x34   :  { %960 = vmatpush1.bf16.msra.mxu0 %v959_v34  ;;  %v111_v54 = vld [vmem:[#allocation5 + $0x120] sm:$0xff]  ;;  %v1029_v56 = vpack.c.bf16 %v114_v49, %v110_v48  ;;  %v113_v57 = vld [vmem:[#allocation5 + $0x130] sm:$0xff]  ;;  %v116_v58 = vld [vmem:[#allocation5 + $0x148] sm:$0xff] }
  0x35   :  { %1024 = vmatpush1.bf16.msra.mxu1 %v1023_v38  ;;  %962 = vmatprep.subr.bf16.mxu0 %v961_v39  ;;  %v120_v59 = vld [vmem:[#allocation5 + $0x168] sm:$0xff]  ;;  %v118_v60 = vld [vmem:[#allocation5 + $0x158] sm:$0xff]  ;;  %v967_v62 = vpack.c.bf16 %v111_v54, %v107_v53  ;;  %v1031_v63 = vpack.c.bf16 %v113_v57, %v109_v55  ;;  %v115_v1 = vld [vmem:[#allocation5 + $0x140] sm:$0xff] }
  0x36   :  { %1026 = vmatprep.subr.bf16.mxu1 %v1025_v43  ;;  %v122_v61 = vld [vmem:[#allocation5 + $0x178] sm:$0xff]  ;;  %v969_v0 = vpack.c.bf16 %v120_v59, %v116_v58  ;;  %v119_v2 = vld [vmem:[#allocation5 + $0x160] sm:$0xff]  ;;  %v117_v3 = vld [vmem:[#allocation5 + $0x150] sm:$0xff] }
  0x37   :  { %v1033_v4 = vpack.c.bf16 %v122_v61, %v118_v60  ;;  %v121_v5 = vld [vmem:[#allocation5 + $0x170] sm:$0xff]  ;;  %v124_v6 = vld [vmem:[#allocation5 + $0x188] sm:$0xff]  ;;  %v126_v8 = vld [vmem:[#allocation5 + $0x198] sm:$0xff]  ;;  %v971_v10 = vpack.c.bf16 %v119_v2, %v115_v1 }
  0x38   :  { %964 = vmatpush1.bf16.msra.mxu0 %v963_v50  ;;  %v128_v7 = vld [vmem:[#allocation5 + $0x1a8] sm:$0xff]  ;;  %v130_v9 = vld [vmem:[#allocation5 + $0x1b8] sm:$0xff]  ;;  %v1035_v11 = vpack.c.bf16 %v121_v5, %v117_v3  ;;  %v123_v13 = vld [vmem:[#allocation5 + $0x180] sm:$0xff] }
  0x39   :  { %1028 = vmatpush1.bf16.msra.mxu1 %v1027_v51  ;;  %966 = vmatprep.subr.bf16.mxu0 %v965_v52  ;;  %v973_v12 = vpack.c.bf16 %v128_v7, %v124_v6  ;;  %v127_v14 = vld [vmem:[#allocation5 + $0x1a0] sm:$0xff]  ;;  %v125_v15 = vld [vmem:[#allocation5 + $0x190] sm:$0xff]  ;;  %v1037_v16 = vpack.c.bf16 %v130_v9, %v126_v8  ;;  %v132_v18 = vld [vmem:[#allocation5 + $0x1c8] sm:$0xff] }
  0x3a   :  { %1030 = vmatprep.subr.bf16.mxu1 %v1029_v56  ;;  %v129_v17 = vld [vmem:[#allocation5 + $0x1b0] sm:$0xff]  ;;  %v136_v19 = vld [vmem:[#allocation5 + $0x1e8] sm:$0xff]  ;;  %v134_v20 = vld [vmem:[#allocation5 + $0x1d8] sm:$0xff]  ;;  %v975_v22 = vpack.c.bf16 %v127_v14, %v123_v13 }
  0x3b   :  { %v138_v21 = vld [vmem:[#allocation5 + $0x1f8] sm:$0xff]  ;;  %v1039_v23 = vpack.c.bf16 %v129_v17, %v125_v15  ;;  %v977_v24 = vpack.c.bf16 %v136_v19, %v132_v18  ;;  %v131_v25 = vld [vmem:[#allocation5 + $0x1c0] sm:$0xff]  ;;  %v133_v27 = vld [vmem:[#allocation5 + $0x1d0] sm:$0xff] }
  0x3c   :  { %968 = vmatpush1.bf16.msra.mxu0 %v967_v62  ;;  %v135_v26 = vld [vmem:[#allocation5 + $0x1e0] sm:$0xff]  ;;  %v1041_v28 = vpack.c.bf16 %v138_v21, %v134_v20  ;;  %v137_v29 = vld [vmem:[#allocation5 + $0x1f0] sm:$0xff]  ;;  %v140_v30 = vld [vmem:[#allocation5 + $0x208] sm:$0xff] }
  0x3d   :  { %1032 = vmatpush1.bf16.msra.mxu1 %v1031_v63  ;;  %970 = vmatprep.subr.bf16.mxu0 %v969_v0  ;;  %v144_v31 = vld [vmem:[#allocation5 + $0x228] sm:$0xff]  ;;  %v142_v32 = vld [vmem:[#allocation5 + $0x218] sm:$0xff]  ;;  %v979_v34 = vpack.c.bf16 %v135_v26, %v131_v25  ;;  %v1043_v35 = vpack.c.bf16 %v137_v29, %v133_v27  ;;  %v139_v37 = vld [vmem:[#allocation5 + $0x200] sm:$0xff] }
  0x3e   :  { %1034 = vmatprep.subr.bf16.mxu1 %v1033_v4  ;;  %v146_v33 = vld [vmem:[#allocation5 + $0x238] sm:$0xff]  ;;  %v981_v36 = vpack.c.bf16 %v144_v31, %v140_v30  ;;  %v143_v38 = vld [vmem:[#allocation5 + $0x220] sm:$0xff]  ;;  %v141_v39 = vld [vmem:[#allocation5 + $0x210] sm:$0xff] }
  0x3f   :  { %v1045_v40 = vpack.c.bf16 %v146_v33, %v142_v32  ;;  %v145_v41 = vld [vmem:[#allocation5 + $0x230] sm:$0xff]  ;;  %v148_v42 = vld [vmem:[#allocation5 + $0x248] sm:$0xff]  ;;  %v150_v44 = vld [vmem:[#allocation5 + $0x258] sm:$0xff]  ;;  %v983_v46 = vpack.c.bf16 %v143_v38, %v139_v37 }
  0x40   :  { %972 = vmatpush1.bf16.msra.mxu0 %v971_v10  ;;  %v152_v43 = vld [vmem:[#allocation5 + $0x268] sm:$0xff]  ;;  %v154_v45 = vld [vmem:[#allocation5 + $0x278] sm:$0xff]  ;;  %v1047_v47 = vpack.c.bf16 %v145_v41, %v141_v39  ;;  %v147_v49 = vld [vmem:[#allocation5 + $0x240] sm:$0xff] }
  0x41   :  { %1036 = vmatpush1.bf16.msra.mxu1 %v1035_v11  ;;  %974 = vmatprep.subr.bf16.mxu0 %v973_v12  ;;  %v985_v48 = vpack.c.bf16 %v152_v43, %v148_v42  ;;  %v151_v50 = vld [vmem:[#allocation5 + $0x260] sm:$0xff]  ;;  %v149_v51 = vld [vmem:[#allocation5 + $0x250] sm:$0xff]  ;;  %v1049_v52 = vpack.c.bf16 %v154_v45, %v150_v44  ;;  %v156_v54 = vld [vmem:[#allocation5 + $0x288] sm:$0xff] }
  0x42   :  { %1038 = vmatprep.subr.bf16.mxu1 %v1037_v16  ;;  %v153_v53 = vld [vmem:[#allocation5 + $0x270] sm:$0xff]  ;;  %v160_v55 = vld [vmem:[#allocation5 + $0x2a8] sm:$0xff]  ;;  %v158_v56 = vld [vmem:[#allocation5 + $0x298] sm:$0xff]  ;;  %v987_v58 = vpack.c.bf16 %v151_v50, %v147_v49 }
  0x43   :  { %v162_v57 = vld [vmem:[#allocation5 + $0x2b8] sm:$0xff]  ;;  %v1051_v59 = vpack.c.bf16 %v153_v53, %v149_v51  ;;  %v989_v60 = vpack.c.bf16 %v160_v55, %v156_v54  ;;  %v155_v61 = vld [vmem:[#allocation5 + $0x280] sm:$0xff]  ;;  %v157_v63 = vld [vmem:[#allocation5 + $0x290] sm:$0xff] }
  0x44   :  { %976 = vmatpush1.bf16.msra.mxu0 %v975_v22  ;;  %v159_v62 = vld [vmem:[#allocation5 + $0x2a0] sm:$0xff]  ;;  %v1053_v0 = vpack.c.bf16 %v162_v57, %v158_v56  ;;  %v161_v1 = vld [vmem:[#allocation5 + $0x2b0] sm:$0xff]  ;;  %v164_v2 = vld [vmem:[#allocation5 + $0x2c8] sm:$0xff] }
  0x45   :  { %1040 = vmatpush1.bf16.msra.mxu1 %v1039_v23  ;;  %978 = vmatprep.subr.bf16.mxu0 %v977_v24  ;;  %v168_v3 = vld [vmem:[#allocation5 + $0x2e8] sm:$0xff]  ;;  %v166_v4 = vld [vmem:[#allocation5 + $0x2d8] sm:$0xff]  ;;  %v991_v6 = vpack.c.bf16 %v159_v62, %v155_v61  ;;  %v163_v7 = vld [vmem:[#allocation5 + $0x2c0] sm:$0xff]  ;;  %v1055_v8 = vpack.c.bf16 %v161_v1, %v157_v63 }
  0x46   :  { %1042 = vmatprep.subr.bf16.mxu1 %v1041_v28  ;;  %v170_v5 = vld [vmem:[#allocation5 + $0x2f8] sm:$0xff]  ;;  %v993_v9 = vpack.c.bf16 %v168_v3, %v164_v2  ;;  %v167_v10 = vld [vmem:[#allocation5 + $0x2e0] sm:$0xff]  ;;  %v165_v11 = vld [vmem:[#allocation5 + $0x2d0] sm:$0xff] }
  0x47   :  { %v169_v12 = vld [vmem:[#allocation5 + $0x2f0] sm:$0xff]  ;;  %v1057_v13 = vpack.c.bf16 %v170_v5, %v166_v4  ;;  %v172_v14 = vld [vmem:[#allocation5 + $0x308] sm:$0xff]  ;;  %v174_v17 = vld [vmem:[#allocation5 + $0x318] sm:$0xff]  ;;  %v995_v19 = vpack.c.bf16 %v167_v10, %v163_v7 }
  0x48   :  { %980 = vmatpush1.bf16.msra.mxu0 %v979_v34  ;;  %v176_v15 = vld [vmem:[#allocation5 + $0x328] sm:$0xff]  ;;  %v178_v18 = vld [vmem:[#allocation5 + $0x338] sm:$0xff]  ;;  %v1059_v20 = vpack.c.bf16 %v169_v12, %v165_v11  ;;  %v171_v22 = vld [vmem:[#allocation5 + $0x300] sm:$0xff] }
  0x49   :  { %1044 = vmatpush1.bf16.msra.mxu1 %v1043_v35  ;;  %982 = vmatprep.subr.bf16.mxu0 %v981_v36  ;;  %v44_v16 = vld [vmem:[#allocation2 + $0x8] sm:$0xff]  ;;  %v997_v21 = vpack.c.bf16 %v176_v15, %v172_v14  ;;  %v175_v23 = vld [vmem:[#allocation5 + $0x320] sm:$0xff]  ;;  %v173_v24 = vld [vmem:[#allocation5 + $0x310] sm:$0xff]  ;;  %v1061_v25 = vpack.c.bf16 %v178_v18, %v174_v17 }
  0x4a   :  { %1046 = vmatprep.subr.bf16.mxu1 %v1045_v40  ;;  %289 = vmatprep.mubr.f32.mxu0 %v44_v16  ;;  %v177_v26 = vld [vmem:[#allocation5 + $0x330] sm:$0xff]  ;;  %v180_v27 = vld [vmem:[#allocation5 + $0x348] sm:$0xff]  ;;  %v182_v29 = vld [vmem:[#allocation5 + $0x358] sm:$0xff]  ;;  %v999_v31 = vpack.c.bf16 %v175_v23, %v171_v22 }
  0x4b   :  { %450 = vmatprep.mubr.f32.mxu1 %v44_v16  ;;  %v184_v28 = vld [vmem:[#allocation5 + $0x368] sm:$0xff]  ;;  %v186_v30 = vld [vmem:[#allocation5 + $0x378] sm:$0xff]  ;;  %v1063_v32 = vpack.c.bf16 %v177_v26, %v173_v24  ;;  %v179_v34 = vld [vmem:[#allocation5 + $0x340] sm:$0xff] }
  0x4c   :  { %984 = vmatpush1.bf16.msra.mxu0 %v983_v46  ;;  %v1001_v33 = vpack.c.bf16 %v184_v28, %v180_v27  ;;  %v183_v35 = vld [vmem:[#allocation5 + $0x360] sm:$0xff]  ;;  %v181_v36 = vld [vmem:[#allocation5 + $0x350] sm:$0xff]  ;;  %v1065_v37 = vpack.c.bf16 %v186_v30, %v182_v29  ;;  %v188_v39 = vld [vmem:[#allocation5 + $0x388] sm:$0xff] }
  0x4d   :  { %1048 = vmatpush1.bf16.msra.mxu1 %v1047_v47  ;;  %986 = vmatprep.subr.bf16.mxu0 %v985_v48  ;;  %v185_v38 = vld [vmem:[#allocation5 + $0x370] sm:$0xff]  ;;  %v192_v40 = vld [vmem:[#allocation5 + $0x3a8] sm:$0xff]  ;;  %v190_v41 = vld [vmem:[#allocation5 + $0x398] sm:$0xff]  ;;  %v1003_v43 = vpack.c.bf16 %v183_v35, %v179_v34 }
  0x4e   :  { %1050 = vmatprep.subr.bf16.mxu1 %v1049_v52  ;;  %v194_v42 = vld [vmem:[#allocation5 + $0x3b8] sm:$0xff]  ;;  %v1067_v44 = vpack.c.bf16 %v185_v38, %v181_v36  ;;  %v1005_v45 = vpack.c.bf16 %v192_v40, %v188_v39  ;;  %v187_v46 = vld [vmem:[#allocation5 + $0x380] sm:$0xff]  ;;  %v189_v48 = vld [vmem:[#allocation5 + $0x390] sm:$0xff] }
  0x4f   :  { %v191_v47 = vld [vmem:[#allocation5 + $0x3a0] sm:$0xff]  ;;  %v1069_v49 = vpack.c.bf16 %v194_v42, %v190_v41  ;;  %v193_v50 = vld [vmem:[#allocation5 + $0x3b0] sm:$0xff]  ;;  %v196_v51 = vld [vmem:[#allocation5 + $0x3c8] sm:$0xff] }
  0x50   :  { %988 = vmatpush1.bf16.msra.mxu0 %v987_v58  ;;  %v200_v52 = vld [vmem:[#allocation5 + $0x3e8] sm:$0xff]  ;;  %v198_v53 = vld [vmem:[#allocation5 + $0x3d8] sm:$0xff]  ;;  %v1007_v55 = vpack.c.bf16 %v191_v47, %v187_v46  ;;  %v1071_v56 = vpack.c.bf16 %v193_v50, %v189_v48  ;;  %v195_v58 = vld [vmem:[#allocation5 + $0x3c0] sm:$0xff] }
  0x51   :  { %1052 = vmatpush1.bf16.msra.mxu1 %v1051_v59  ;;  %990 = vmatprep.subr.bf16.mxu0 %v989_v60  ;;  %v202_v54 = vld [vmem:[#allocation5 + $0x3f8] sm:$0xff]  ;;  %v1009_v57 = vpack.c.bf16 %v200_v52, %v196_v51  ;;  %v199_v59 = vld [vmem:[#allocation5 + $0x3e0] sm:$0xff]  ;;  %v197_v61 = vld [vmem:[#allocation5 + $0x3d0] sm:$0xff] }
  0x52   :  { %1054 = vmatprep.subr.bf16.mxu1 %v1053_v0  ;;  %v1073_v60 = vpack.c.bf16 %v202_v54, %v198_v53  ;;  %v201_v62 = vld [vmem:[#allocation5 + $0x3f0] sm:$0xff]  ;;  %v1011_v63 = vpack.c.bf16 %v199_v59, %v195_v58  ;;  %v43_v1 = vld [vmem:[#allocation2] sm:$0xff]  ;;  %v46_v2 = vld [vmem:[#allocation2 + $0x18] sm:$0xff] }
  0x53   :  { %v1075_v0 = vpack.c.bf16 %v201_v62, %v197_v61  ;;  %v45_v3 = vld [vmem:[#allocation2 + $0x10] sm:$0xff]  ;;  %v48_v4 = vld [vmem:[#allocation2 + $0x28] sm:$0xff]  ;;  %v47_v5 = vld [vmem:[#allocation2 + $0x20] sm:$0xff] }
  0x54   :  { %992 = vmatpush1.bf16.msra.mxu0 %v991_v6  ;;  %v50_v6 = vld [vmem:[#allocation2 + $0x38] sm:$0xff]  ;;  %v49_v7 = vld [vmem:[#allocation2 + $0x30] sm:$0xff]  ;;  %v56_v12 = vld [vmem:[#allocation2 + $0x68] sm:$0xff] }
  0x55   :  { %1056 = vmatpush1.bf16.msra.mxu1 %v1055_v8  ;;  %994 = vmatprep.subr.bf16.mxu0 %v993_v9  ;;  %v52_v8 = vld [vmem:[#allocation2 + $0x48] sm:$0xff]  ;;  %v51_v9 = vld [vmem:[#allocation2 + $0x40] sm:$0xff]  ;;  %v54_v10 = vld [vmem:[#allocation2 + $0x58] sm:$0xff] }
  0x56   :  { %1058 = vmatprep.subr.bf16.mxu1 %v1057_v13  ;;  %v53_v11 = vld [vmem:[#allocation2 + $0x50] sm:$0xff]  ;;  %v55_v13 = vld [vmem:[#allocation2 + $0x60] sm:$0xff]  ;;  %v58_v14 = vld [vmem:[#allocation2 + $0x78] sm:$0xff] }
  0x57   :  { %v57_v15 = vld [vmem:[#allocation2 + $0x70] sm:$0xff]  ;;  %v60_v16 = vld [vmem:[#allocation2 + $0x88] sm:$0xff]  ;;  %v59_v17 = vld [vmem:[#allocation2 + $0x80] sm:$0xff] }
  0x58   :  { %996 = vmatpush1.bf16.msra.mxu0 %v995_v19  ;;  %v62_v18 = vld [vmem:[#allocation2 + $0x98] sm:$0xff]  ;;  %v61_v19 = vld [vmem:[#allocation2 + $0x90] sm:$0xff]  ;;  %v68_v24 = vld [vmem:[#allocation2 + $0xc8] sm:$0xff] }
  0x59   :  { %1060 = vmatpush1.bf16.msra.mxu1 %v1059_v20  ;;  %998 = vmatprep.subr.bf16.mxu0 %v997_v21  ;;  %v64_v20 = vld [vmem:[#allocation2 + $0xa8] sm:$0xff]  ;;  %v63_v21 = vld [vmem:[#allocation2 + $0xa0] sm:$0xff]  ;;  %v66_v22 = vld [vmem:[#allocation2 + $0xb8] sm:$0xff] }
  0x5a   :  { %1062 = vmatprep.subr.bf16.mxu1 %v1061_v25  ;;  %v65_v23 = vld [vmem:[#allocation2 + $0xb0] sm:$0xff]  ;;  %v67_v25 = vld [vmem:[#allocation2 + $0xc0] sm:$0xff]  ;;  %v70_v26 = vld [vmem:[#allocation2 + $0xd8] sm:$0xff] }
  0x5b   :  { %v69_v27 = vld [vmem:[#allocation2 + $0xd0] sm:$0xff]  ;;  %v72_v28 = vld [vmem:[#allocation2 + $0xe8] sm:$0xff]  ;;  %v71_v29 = vld [vmem:[#allocation2 + $0xe0] sm:$0xff] }
  0x5c   :  { %1000 = vmatpush1.bf16.msra.mxu0 %v999_v31  ;;  %v74_v30 = vld [vmem:[#allocation2 + $0xf8] sm:$0xff]  ;;  %v73_v31 = vld [vmem:[#allocation2 + $0xf0] sm:$0xff]  ;;  %v203_v35 = vld [vmem:[%s1762_s2] sm:$0xf]  ;;  %s1290_s2 = smov [#allocation7]  }
  0x5d   :  { %1064 = vmatpush1.bf16.msra.mxu1 %v1063_v32  ;;  %1002 = vmatprep.subr.bf16.mxu0 %v1001_v33  ;;  %v205_v32 = vlaneseq  ;;  %s936_s13 = sshll.u32 %s1290_s2, 4  ;;  %s937_s13 = int_to_ptr.vmem [resolvable:$true] %s936_s13 }
  0x5e   :  { %1066 = vmatprep.subr.bf16.mxu1 %v1065_v37  ;;  %s1256_s14 = scalar_lea.vmem %s937_s13, 8192  ;;  %p1261_p3 = scmp.lt.s32.totalorder %s937_s13, %s937_s13 }
  0x5f   :  { %v206_v33 = vshrl.u32 %v205_v32, 7  ;;  %p1257_p2 = scmp.ne.s32.totalorder %s937_s13, %s1256_s14  ;;  %p1262_p4 = scmp.lt.s32.totalorder %s1256_s14, %s1256_s14 }
  0x60   :  { %1004 = vmatpush1.bf16.msra.mxu0 %v1003_v43 }
  0x61   :  { %1068 = vmatpush1.bf16.msra.mxu1 %v1067_v44  ;;  %1006 = vmatprep.subr.bf16.mxu0 %v1005_v45  ;;  %v207_v34 = vsub.s32 0, %v206_v33  ;;  %v215_v36 = vsub.s32 2, %v206_v33  ;;  %v211_v37 = vsub.s32 1, %v206_v33  ;;  %v219_v38 = vsub.s32 3, %v206_v33  ;;  %p1263_p5 = por %p1262_p4, %p1261_p3 }
  0x62   :  { %1070 = vmatprep.subr.bf16.mxu1 %v1069_v49 }
  0x63   :  { %v1341_v39 = vrot.slane %v203_v35, %v207_v34  ;;  %v1343_v40 = vrot.slane %v203_v35, %v215_v36  ;;  %v1345_v41 = vrot.slane %v203_v35, %v211_v37  ;;  %v1347_v42 = vrot.slane %v203_v35, %v219_v38  ;;  %p1264_p6 = pnand %p1263_p5, %p1257_p2 }
  0x64   :  { %1008 = vmatpush1.bf16.msra.mxu0 %v1007_v55 }
  0x65   :  { %1072 = vmatpush1.bf16.msra.mxu1 %v1071_v56  ;;  %1010 = vmatprep.subr.bf16.mxu0 %v1009_v57 }
  0x66   :  { %1074 = vmatprep.subr.bf16.mxu1 %v1073_v60 }
  0x68   :  { %1012 = vmatpush1.bf16.msra.mxu0 %v1011_v63 }
  0x69   :  { %1076 = vmatpush1.bf16.msra.mxu1 %v1075_v0 }
  0x6b   :  { %290 = vmatmul.mubr.f32.vlgmr.msra.gmra.mrb[0].mxu0 %v43_v1 }
  0x6c   :  { %451 = vmatmul.mubr.f32.vlgmr.msra.gmra.mrb[0].mxu1 %v43_v1  ;;  %295 = vmatprep.mubr.f32.mxu0 %v46_v2 }
  0x6d   :  { %456 = vmatprep.mubr.f32.mxu1 %v46_v2 }
  0x6f   :  { %296 = vmatmul.mubr.f32.gmra.mrb[2].mxu0 %v45_v3 }
  0x70   :  { %457 = vmatmul.mubr.f32.gmra.mrb[2].mxu1 %v45_v3  ;;  %301 = vmatprep.mubr.f32.mxu0 %v48_v4 }
  0x71   :  { %462 = vmatprep.mubr.f32.mxu1 %v48_v4 }
  0x73   :  { %302 = vmatmul.mubr.f32.gmra.mrb[4].mxu0 %v47_v5 }
  0x74   :  { %463 = vmatmul.mubr.f32.gmra.mrb[4].mxu1 %v47_v5  ;;  %307 = vmatprep.mubr.f32.mxu0 %v50_v6 }
  0x75   :  { %468 = vmatprep.mubr.f32.mxu1 %v50_v6 }
  0x77   :  { %308 = vmatmul.mubr.f32.gmra.mrb[6].mxu0 %v49_v7 }
  0x78   :  { %469 = vmatmul.mubr.f32.gmra.mrb[6].mxu1 %v49_v7  ;;  %313 = vmatprep.mubr.f32.mxu0 %v52_v8 }
  0x79   :  { %474 = vmatprep.mubr.f32.mxu1 %v52_v8 }
  0x7b   :  { %314 = vmatmul.mubr.f32.gmra.mrb[8].mxu0 %v51_v9 }
  0x7c   :  { %475 = vmatmul.mubr.f32.gmra.mrb[8].mxu1 %v51_v9  ;;  %319 = vmatprep.mubr.f32.mxu0 %v54_v10 }
  0x7d   :  { %480 = vmatprep.mubr.f32.mxu1 %v54_v10 }
  0x7f   :  { %320 = vmatmul.mubr.f32.gmra.mrb[10].mxu0 %v53_v11 }
  0x80   :  { %481 = vmatmul.mubr.f32.gmra.mrb[10].mxu1 %v53_v11  ;;  %325 = vmatprep.mubr.f32.mxu0 %v56_v12 }
  0x81   :  { %486 = vmatprep.mubr.f32.mxu1 %v56_v12 }
  0x83   :  { %326 = vmatmul.mubr.f32.gmra.mrb[12].mxu0 %v55_v13 }
  0x84   :  { %487 = vmatmul.mubr.f32.gmra.mrb[12].mxu1 %v55_v13  ;;  %331 = vmatprep.mubr.f32.mxu0 %v58_v14 }
  0x85   :  { %492 = vmatprep.mubr.f32.mxu1 %v58_v14 }
  0x87   :  { %332 = vmatmul.mubr.f32.gmra.mrb[14].mxu0 %v57_v15 }
  0x88   :  { %493 = vmatmul.mubr.f32.gmra.mrb[14].mxu1 %v57_v15  ;;  %337 = vmatprep.mubr.f32.mxu0 %v60_v16 }
  0x89   :  { %498 = vmatprep.mubr.f32.mxu1 %v60_v16 }
  0x8b   :  { %338 = vmatmul.mubr.f32.gmra.mrb[16].mxu0 %v59_v17 }
  0x8c   :  { %499 = vmatmul.mubr.f32.gmra.mrb[16].mxu1 %v59_v17  ;;  %343 = vmatprep.mubr.f32.mxu0 %v62_v18 }
  0x8d   :  { %504 = vmatprep.mubr.f32.mxu1 %v62_v18 }
  0x8f   :  { %344 = vmatmul.mubr.f32.gmra.mrb[18].mxu0 %v61_v19 }
  0x90   :  { %505 = vmatmul.mubr.f32.gmra.mrb[18].mxu1 %v61_v19  ;;  %349 = vmatprep.mubr.f32.mxu0 %v64_v20 }
  0x91   :  { %510 = vmatprep.mubr.f32.mxu1 %v64_v20 }
  0x93   :  { %350 = vmatmul.mubr.f32.gmra.mrb[20].mxu0 %v63_v21 }
  0x94   :  { %511 = vmatmul.mubr.f32.gmra.mrb[20].mxu1 %v63_v21  ;;  %355 = vmatprep.mubr.f32.mxu0 %v66_v22 }
  0x95   :  { %516 = vmatprep.mubr.f32.mxu1 %v66_v22 }
  0x97   :  { %356 = vmatmul.mubr.f32.gmra.mrb[22].mxu0 %v65_v23 }
  0x98   :  { %517 = vmatmul.mubr.f32.gmra.mrb[22].mxu1 %v65_v23  ;;  %361 = vmatprep.mubr.f32.mxu0 %v68_v24 }
  0x99   :  { %522 = vmatprep.mubr.f32.mxu1 %v68_v24 }
  0x9b   :  { %362 = vmatmul.mubr.f32.gmra.mrb[24].mxu0 %v67_v25 }
  0x9c   :  { %523 = vmatmul.mubr.f32.gmra.mrb[24].mxu1 %v67_v25  ;;  %367 = vmatprep.mubr.f32.mxu0 %v70_v26 }
  0x9d   :  { %528 = vmatprep.mubr.f32.mxu1 %v70_v26 }
  0x9f   :  { %368 = vmatmul.mubr.f32.gmra.mrb[26].mxu0 %v69_v27 }
  0xa0   :  { %529 = vmatmul.mubr.f32.gmra.mrb[26].mxu1 %v69_v27  ;;  %373 = vmatprep.mubr.f32.mxu0 %v72_v28 }
  0xa1   :  { %534 = vmatprep.mubr.f32.mxu1 %v72_v28 }
  0xa3   :  { %374 = vmatmul.mubr.f32.gmra.mrb[28].mxu0 %v71_v29 }
  0xa4   :  { %535 = vmatmul.mubr.f32.gmra.mrb[28].mxu1 %v71_v29  ;;  %379 = vmatprep.mubr.f32.mxu0 %v74_v30 }
  0xa5   :  { %540 = vmatprep.mubr.f32.mxu1 %v74_v30 }
  0xa7   :  { %380 = vmatmul.mubr.f32.gmra.mrb[30].mxu0 %v73_v31 }
  0xa8   :  { %541 = vmatmul.mubr.f32.gmra.mrb[30].mxu1 %v73_v31 }
 0x13e   :  { %v291_v43 = vpop.f32.mrb[0].mxu0 }
 0x13f   :  { %v292_v44 = vadd.f32 %v291_v43, %v1341_v39  ;;  %v452_v45 = vpop.f32.mrb[0].mxu1  ;;  %v293_v46 = vpop.f32.mrb[1].mxu0 }
 0x140   :  { %v453_v47 = vadd.f32 %v452_v45, %v1343_v40  ;;  %v294_v48 = vadd.f32 %v293_v46, %v1345_v41  ;;  %v454_v49 = vpop.f32.mrb[1].mxu1 }
 0x141   :  { %v611_v50 = vmul.f32 0.70710677, %v292_v44  ;;  %v455_v51 = vadd.f32 %v454_v49, %v1347_v42  ;;  %v547_v10 = vmul.f32 0.5, %v292_v44 }
 0x142   :  { %v613_v52 = vmul.f32 0.70710677, %v453_v47  ;;  %v612_v53 = vmul.f32 0.70710677, %v294_v48  ;;  %v297_v55 = vpop.f32.mrb[2].mxu0  ;;  %v549_v14 = vmul.f32 0.5, %v453_v47 }
 0x143   :  { %1084 = verf.f32 %v611_v50  ;;  %v614_v54 = vmul.f32 0.70710677, %v455_v51  ;;  %v458_v56 = vpop.f32.mrb[2].mxu1  ;;  %v298_v57 = vadd.f32 %v297_v55, %v1341_v39  ;;  %v299_v59 = vpop.f32.mrb[3].mxu0  ;;  %v548_v15 = vmul.f32 0.5, %v294_v48 }
 0x144   :  { %1086 = verf.f32 %v613_v52  ;;  %v459_v58 = vadd.f32 %v458_v56, %v1343_v40  ;;  %v460_v60 = vpop.f32.mrb[3].mxu1  ;;  %v300_v61 = vadd.f32 %v299_v59, %v1345_v41  ;;  %v550_v19 = vmul.f32 0.5, %v455_v51 }
 0x145   :  { %1088 = verf.f32 %v612_v53  ;;  %v461_v62 = vadd.f32 %v460_v60, %v1347_v42  ;;  %v615_v63 = vmul.f32 0.70710677, %v298_v57  ;;  %v551_v24 = vmul.f32 0.5, %v298_v57 }
 0x146   :  { %1090 = verf.f32 %v614_v54  ;;  %v303_v0 = vpop.f32.mrb[4].mxu0  ;;  %v617_v1 = vmul.f32 0.70710677, %v459_v58  ;;  %v616_v2 = vmul.f32 0.70710677, %v300_v61  ;;  %v553_v29 = vmul.f32 0.5, %v459_v58 }
 0x147   :  { %1092 = verf.f32 %v615_v63  ;;  %v618_v3 = vmul.f32 0.70710677, %v461_v62  ;;  %v304_v4 = vadd.f32 %v303_v0, %v1341_v39  ;;  %v464_v5 = vpop.f32.mrb[4].mxu1  ;;  %v305_v6 = vpop.f32.mrb[5].mxu0  ;;  %v552_v45 = vmul.f32 0.5, %v300_v61 }
 0x148   :  { %1094 = verf.f32 %v617_v1  ;;  %v1359_v7 = vadd.f32 %v464_v5, %v1343_v40  ;;  %v1362_v8 = vadd.f32 %v305_v6, %v1345_v41  ;;  %v466_v9 = vpop.f32.mrb[5].mxu1  ;;  %v554_v50 = vmul.f32 0.5, %v461_v62 }
 0x149   :  { %1096 = verf.f32 %v616_v2  ;;  %v619_v11 = vmul.f32 0.70710677, %v304_v4  ;;  %v1365_v12 = vadd.f32 %v466_v9, %v1347_v42  ;;  %v555_v53 = vmul.f32 0.5, %v304_v4 }
 0x14a   :  { %v309_v13 = vpop.f32.mrb[6].mxu0  ;;  %1098 = verf.f32 %v618_v3  ;;  %v621_v16 = vmul.f32 0.70710677, %v1359_v7  ;;  %v620_v20 = vmul.f32 0.70710677, %v1362_v8  ;;  %v557_v9 = vmul.f32 0.5, %v1359_v7 }
 0x14b   :  { %v470_v17 = vpop.f32.mrb[6].mxu1  ;;  %v311_v18 = vpop.f32.mrb[7].mxu0  ;;  %1100 = verf.f32 %v619_v11  ;;  %v622_v21 = vmul.f32 0.70710677, %v1365_v12  ;;  %v1371_v25 = vadd.f32 %v309_v13, %v1341_v39 }
 0x14c   :  { %v472_v22 = vpop.f32.mrb[7].mxu1  ;;  %1102 = verf.f32 %v621_v16  ;;  %v1374_v26 = vadd.f32 %v470_v17, %v1343_v40  ;;  %v1377_v30 = vadd.f32 %v311_v18, %v1345_v41 }
 0x14d   :  { %v1085_v23 = vpop.eup %1084  ;;  %1104 = verf.f32 %v620_v20  ;;  %v623_v34 = vmul.f32 0.70710677, %v1371_v25  ;;  %v1381_v35 = vadd.f32 %v472_v22, %v1347_v42  ;;  %v558_v20 = vmul.f32 0.5, %v1365_v12 }
 0x14e   :  { %v1087_v27 = vpop.eup %1086  ;;  %v739_v28 = vadd.f32 1.0, %v1085_v23  ;;  %v315_v31 = vpop.f32.mrb[8].mxu0  ;;  %1106 = verf.f32 %v622_v21  ;;  %v625_v46 = vmul.f32 0.70710677, %v1374_v26  ;;  %v624_v54 = vmul.f32 0.70710677, %v1377_v30 }
 0x14f   :  { %v1089_v32 = vpop.eup %1088  ;;  %v741_v33 = vadd.f32 1.0, %v1087_v27  ;;  %v476_v36 = vpop.f32.mrb[8].mxu1  ;;  %1108 = verf.f32 %v623_v34  ;;  %v626_v59 = vmul.f32 0.70710677, %v1381_v35  ;;  %v1387_v60 = vadd.f32 %v315_v31, %v1341_v39 }
 0x150   :  { %v317_v37 = vpop.f32.mrb[9].mxu0  ;;  %v1091_v38 = vpop.eup %1090  ;;  %v803_v43 = vmul.f32 %v739_v28, %v547_v10  ;;  %v740_v44 = vadd.f32 1.0, %v1089_v32  ;;  %1110 = verf.f32 %v625_v46  ;;  %v1392_v1 = vadd.f32 %v476_v36, %v1343_v40 }
 0x151   :  { %v478_v47 = vpop.f32.mrb[9].mxu1  ;;  %v805_v48 = vmul.f32 %v741_v33, %v549_v14  ;;  %v742_v49 = vadd.f32 1.0, %v1091_v38  ;;  %v1093_v51 = vpop.eup %1092  ;;  %1112 = verf.f32 %v624_v54  ;;  %v1395_v2 = vadd.f32 %v317_v37, %v1345_v41 }
 0x152   :  { %867 = vst [vmem:[#allocation7] sm:$0xff] %v803_v43  ;;  %v804_v52 = vmul.f32 %v740_v44, %v548_v15  ;;  %v321_v55 = vpop.f32.mrb[10].mxu0  ;;  %v1095_v56 = vpop.eup %1094  ;;  %v743_v58 = vadd.f32 1.0, %v1093_v51  ;;  %1114 = verf.f32 %v626_v59  ;;  %v556_v14 = vmul.f32 0.5, %v1362_v8 }
 0x153   :  { %869 = vst [vmem:[#allocation7 + $0x10] sm:$0xff] %v805_v48  ;;  %v806_v57 = vmul.f32 %v742_v49, %v550_v19  ;;  %v482_v61 = vpop.f32.mrb[10].mxu1  ;;  %v1389_v62 = vpop.f32.mrb[11].mxu0  ;;  %v745_v0 = vadd.f32 1.0, %v1095_v56  ;;  %v627_v15 = vmul.f32 0.70710677, %v1387_v60  ;;  %v1412_v12 = vadd.f32 %v478_v47, %v1347_v42 }
 0x154   :  { %v1097_v63 = vpop.eup %1096  ;;  %868 = vst [vmem:[#allocation7 + $0x8] sm:$0xff] %v804_v52  ;;  %v1397_v3 = vpop.f32.mrb[11].mxu1  ;;  %v807_v5 = vmul.f32 %v743_v58, %v551_v24  ;;  %v629_v21 = vmul.f32 0.70710677, %v1392_v1  ;;  %v628_v8 = vmul.f32 0.70710677, %v1395_v2  ;;  %v1415_v36 = vadd.f32 %v321_v55, %v1341_v39 }
 0x155   :  { %v1099_v4 = vpop.eup %1098  ;;  %870 = vst [vmem:[#allocation7 + $0x18] sm:$0xff] %v806_v57  ;;  %v744_v6 = vadd.f32 1.0, %v1097_v63  ;;  %v809_v11 = vmul.f32 %v745_v0, %v553_v29  ;;  %1116 = verf.f32 %v627_v15  ;;  %v559_v44 = vmul.f32 0.5, %v1371_v25 }
 0x156   :  { %v1101_v10 = vpop.eup %1100  ;;  %v746_v13 = vadd.f32 1.0, %v1099_v4  ;;  %v327_v16 = vpop.f32.mrb[12].mxu0  ;;  %871 = vst [vmem:[#allocation7 + $0x20] sm:$0xff] %v807_v5  ;;  %1118 = verf.f32 %v629_v21  ;;  %v1420_v46 = vadd.f32 %v482_v61, %v1343_v40  ;;  %v561_v52 = vmul.f32 0.5, %v1374_v26 }
 0x157   :  { %v1103_v17 = vpop.eup %1102  ;;  %v808_v18 = vmul.f32 %v744_v6, %v552_v45  ;;  %v747_v19 = vadd.f32 1.0, %v1101_v10  ;;  %v1404_v22 = vpop.f32.mrb[12].mxu1  ;;  %873 = vst [vmem:[#allocation7 + $0x30] sm:$0xff] %v809_v11  ;;  %1120 = verf.f32 %v628_v8  ;;  %v630_v45 = vmul.f32 0.70710677, %v1412_v12 }
 0x158   :  { %v1406_v7 = vpop.f32.mrb[13].mxu0  ;;  %v1105_v23 = vpop.eup %1104  ;;  %v810_v24 = vmul.f32 %v746_v13, %v554_v50  ;;  %v749_v27 = vadd.f32 1.0, %v1103_v17  ;;  %v560_v55 = vmul.f32 0.5, %v1377_v30  ;;  %v633_v56 = vmul.f32 0.70710677, %v1420_v46 }
 0x159   :  { %v1409_v28 = vpop.f32.mrb[13].mxu1  ;;  %v1107_v29 = vpop.eup %1106  ;;  %872 = vst [vmem:[#allocation7 + $0x28] sm:$0xff] %v808_v18  ;;  %v811_v31 = vmul.f32 %v747_v19, %v555_v53  ;;  %v748_v32 = vadd.f32 1.0, %v1105_v23  ;;  %v631_v53 = vmul.f32 0.70710677, %v1415_v36  ;;  %1122 = verf.f32 %v630_v45 }
 0x15a   :  { %874 = vst [vmem:[#allocation7 + $0x38] sm:$0xff] %v810_v24  ;;  %v813_v33 = vmul.f32 %v749_v27, %v557_v9  ;;  %v750_v34 = vadd.f32 1.0, %v1107_v29  ;;  %v333_v37 = vpop.f32.mrb[14].mxu0  ;;  %v1109_v38 = vpop.eup %1108  ;;  %v1434_v59 = vadd.f32 %v1389_v62, %v1345_v41  ;;  %v1438_v26 = vadd.f32 %v1397_v3, %v1347_v42 }
 0x15b   :  { %875 = vst [vmem:[#allocation7 + $0x40] sm:$0xff] %v811_v31  ;;  %v812_v43 = vmul.f32 %v748_v32, %v556_v14  ;;  %v1422_v47 = vpop.f32.mrb[14].mxu1  ;;  %v1424_v48 = vpop.f32.mrb[15].mxu0  ;;  %v751_v51 = vadd.f32 1.0, %v1109_v38  ;;  %1124 = verf.f32 %v631_v53  ;;  %v1443_v4 = vadd.f32 %v327_v16, %v1341_v39 }
 0x15c   :  { %v1111_v49 = vpop.eup %1110  ;;  %877 = vst [vmem:[#allocation7 + $0x50] sm:$0xff] %v813_v33  ;;  %v814_v50 = vmul.f32 %v750_v34, %v558_v20  ;;  %v1428_v54 = vpop.f32.mrb[15].mxu1  ;;  %1126 = verf.f32 %v633_v56  ;;  %v562_v62 = vmul.f32 0.5, %v1381_v35  ;;  %v632_v3 = vmul.f32 0.70710677, %v1434_v59 }
 0x15d   :  { %876 = vst [vmem:[#allocation7 + $0x48] sm:$0xff] %v812_v43  ;;  %v753_v25 = vadd.f32 1.0, %v1111_v49  ;;  %v1113_v57 = vpop.eup %1112  ;;  %v815_v58 = vmul.f32 %v751_v51, %v559_v44  ;;  %v563_v13 = vmul.f32 0.5, %v1387_v60  ;;  %v634_v14 = vmul.f32 0.70710677, %v1438_v26 }
 0x15e   :  { %878 = vst [vmem:[#allocation7 + $0x58] sm:$0xff] %v814_v50  ;;  %v1440_v61 = vpop.f32.mrb[16].mxu0  ;;  %v1115_v63 = vpop.eup %1114  ;;  %v752_v30 = vadd.f32 1.0, %v1113_v57  ;;  %v635_v15 = vmul.f32 0.70710677, %v1443_v4  ;;  %1128 = verf.f32 %v632_v3  ;;  %v1458_v18 = vadd.f32 %v1404_v22, %v1343_v40 }
 0x15f   :  { %v817_v0 = vmul.f32 %v753_v25, %v561_v52  ;;  %v1445_v5 = vpop.f32.mrb[16].mxu1  ;;  %v1447_v6 = vpop.f32.mrb[17].mxu0  ;;  %879 = vst [vmem:[#allocation7 + $0x60] sm:$0xff] %v815_v58  ;;  %v754_v9 = vadd.f32 1.0, %v1115_v63  ;;  %v1462_v35 = vadd.f32 %v1406_v7, %v1345_v41  ;;  %1130 = verf.f32 %v634_v14 }
 0x160   :  { %v1451_v10 = vpop.f32.mrb[17].mxu1  ;;  %v816_v11 = vmul.f32 %v752_v30, %v560_v55  ;;  %v1117_v16 = vpop.eup %1116  ;;  %v1468_v21 = vadd.f32 %v1409_v28, %v1347_v42  ;;  %v1471_v23 = vadd.f32 %v333_v37, %v1341_v39  ;;  %v565_v7 = vmul.f32 0.5, %v1392_v1 }
 0x161   :  { %881 = vst [vmem:[#allocation7 + $0x70] sm:$0xff] %v817_v0  ;;  %v818_v17 = vmul.f32 %v754_v9, %v562_v62  ;;  %v1119_v20 = vpop.eup %1118  ;;  %v755_v60 = vadd.f32 1.0, %v1117_v16  ;;  %1132 = verf.f32 %v635_v15  ;;  %v637_v29 = vmul.f32 0.70710677, %v1458_v18 }
 0x162   :  { %v1464_v19 = vpop.f32.mrb[18].mxu0  ;;  %880 = vst [vmem:[#allocation7 + $0x68] sm:$0xff] %v816_v11  ;;  %v1121_v27 = vpop.eup %1120  ;;  %v757_v8 = vadd.f32 1.0, %v1119_v20  ;;  %v564_v28 = vmul.f32 0.5, %v1395_v2  ;;  %v636_v34 = vmul.f32 0.70710677, %v1462_v35  ;;  %v1495_v53 = vadd.f32 %v1422_v47, %v1343_v40 }
 0x163   :  { %v1473_v24 = vpop.f32.mrb[18].mxu1  ;;  %v1475_v22 = vpop.f32.mrb[19].mxu0  ;;  %882 = vst [vmem:[#allocation7 + $0x78] sm:$0xff] %v818_v17  ;;  %v819_v32 = vmul.f32 %v755_v60, %v563_v13  ;;  %v756_v33 = vadd.f32 1.0, %v1121_v27  ;;  %v566_v38 = vmul.f32 0.5, %v1412_v12  ;;  %1134 = verf.f32 %v637_v29 }
 0x164   :  { %v1479_v31 = vpop.f32.mrb[19].mxu1  ;;  %v821_v37 = vmul.f32 %v757_v8, %v565_v7  ;;  %v638_v43 = vmul.f32 0.70710677, %v1468_v21  ;;  %v1123_v1 = vpop.eup %1122  ;;  %v567_v49 = vmul.f32 0.5, %v1415_v36  ;;  %1136 = verf.f32 %v636_v34 }
 0x165   :  { %883 = vst [vmem:[#allocation7 + $0x80] sm:$0xff] %v819_v32  ;;  %v820_v45 = vmul.f32 %v756_v33, %v564_v28  ;;  %v639_v50 = vmul.f32 0.70710677, %v1471_v23  ;;  %v1125_v52 = vpop.eup %1124  ;;  %v758_v12 = vadd.f32 1.0, %v1123_v1  ;;  %v1499_v25 = vadd.f32 %v1424_v48, %v1345_v41 }
 0x166   :  { %v1485_v44 = vpop.f32.mrb[20].mxu0  ;;  %885 = vst [vmem:[#allocation7 + $0x90] sm:$0xff] %v821_v37  ;;  %1138 = verf.f32 %v638_v43  ;;  %v1127_v55 = vpop.eup %1126  ;;  %v759_v56 = vadd.f32 1.0, %v1125_v52  ;;  %v1505_v57 = vadd.f32 %v1428_v54, %v1347_v42  ;;  %v1509_v58 = vadd.f32 %v1440_v61, %v1341_v39 }
 0x167   :  { %v1489_v2 = vpop.f32.mrb[20].mxu1  ;;  %v1491_v51 = vpop.f32.mrb[21].mxu0  ;;  %884 = vst [vmem:[#allocation7 + $0x88] sm:$0xff] %v820_v45  ;;  %1140 = verf.f32 %v639_v50  ;;  %v822_v47 = vmul.f32 %v758_v12, %v566_v38  ;;  %v569_v63 = vmul.f32 0.5, %v1420_v46  ;;  %v761_v0 = vadd.f32 1.0, %v1127_v55 }
 0x168   :  { %v1501_v36 = vpop.f32.mrb[21].mxu1  ;;  %v641_v48 = vmul.f32 0.70710677, %v1495_v53  ;;  %v823_v62 = vmul.f32 %v759_v56, %v567_v49  ;;  %v568_v9 = vmul.f32 0.5, %v1434_v59  ;;  %v570_v3 = vmul.f32 0.5, %v1438_v26  ;;  %v1129_v61 = vpop.eup %1128 }
 0x169   :  { %v640_v54 = vmul.f32 0.70710677, %v1499_v25  ;;  %886 = vst [vmem:[#allocation7 + $0x98] sm:$0xff] %v822_v47  ;;  %v825_v14 = vmul.f32 %v761_v0, %v569_v63  ;;  %v571_v46 = vmul.f32 0.5, %v1443_v4  ;;  %v642_v15 = vmul.f32 0.70710677, %v1505_v57  ;;  %v1131_v17 = vpop.eup %1130 }
 0x16a   :  { %v1513_v30 = vpop.f32.mrb[22].mxu0  ;;  %1142 = verf.f32 %v641_v48  ;;  %887 = vst [vmem:[#allocation7 + $0xa0] sm:$0xff] %v823_v62  ;;  %v760_v59 = vadd.f32 1.0, %v1129_v61  ;;  %v643_v26 = vmul.f32 0.70710677, %v1509_v58  ;;  %v1529_v20 = vadd.f32 %v1445_v5, %v1343_v40 }
 0x16b   :  { %v1518_v11 = vpop.f32.mrb[22].mxu1  ;;  %v1520_v13 = vpop.f32.mrb[23].mxu0  ;;  %1144 = verf.f32 %v640_v54  ;;  %889 = vst [vmem:[#allocation7 + $0xb0] sm:$0xff] %v825_v14  ;;  %v762_v27 = vadd.f32 1.0, %v1131_v17  ;;  %v1533_v4 = vadd.f32 %v1447_v6, %v1345_v41  ;;  %v1537_v7 = vadd.f32 %v1451_v10, %v1347_v42 }
 0x16c   :  { %v1524_v16 = vpop.f32.mrb[23].mxu1  ;;  %v1133_v60 = vpop.eup %1132  ;;  %1146 = verf.f32 %v642_v15  ;;  %v824_v29 = vmul.f32 %v760_v59, %v568_v9  ;;  %v573_v28 = vmul.f32 0.5, %v1458_v18  ;;  %v572_v6 = vmul.f32 0.5, %v1462_v35 }
 0x16d   :  { %v763_v32 = vadd.f32 1.0, %v1133_v60  ;;  %1148 = verf.f32 %v643_v26  ;;  %v1135_v34 = vpop.eup %1134  ;;  %v826_v37 = vmul.f32 %v762_v27, %v570_v3  ;;  %v645_v38 = vmul.f32 0.70710677, %v1529_v20 }
 0x16e   :  { %v1539_v8 = vpop.f32.mrb[24].mxu0  ;;  %v644_v10 = vmul.f32 0.70710677, %v1533_v4  ;;  %v1137_v1 = vpop.eup %1136  ;;  %888 = vst [vmem:[#allocation7 + $0xa8] sm:$0xff] %v824_v29  ;;  %v765_v49 = vadd.f32 1.0, %v1135_v34  ;;  %v574_v18 = vmul.f32 0.5, %v1468_v21  ;;  %v1555_v35 = vadd.f32 %v1464_v19, %v1341_v39 }
 0x16f   :  { %v1542_v5 = vpop.f32.mrb[24].mxu1  ;;  %v1544_v33 = vpop.f32.mrb[25].mxu0  ;;  %v827_v45 = vmul.f32 %v763_v32, %v571_v46  ;;  %v646_v50 = vmul.f32 0.70710677, %v1537_v7  ;;  %890 = vst [vmem:[#allocation7 + $0xb8] sm:$0xff] %v826_v37  ;;  %v764_v12 = vadd.f32 1.0, %v1137_v1  ;;  %1150 = verf.f32 %v645_v38 }
 0x170   :  { %v1549_v43 = vpop.f32.mrb[25].mxu1  ;;  %v1139_v52 = vpop.eup %1138  ;;  %v1559_v55 = vadd.f32 %v1473_v24, %v1343_v40  ;;  %v829_v63 = vmul.f32 %v765_v49, %v573_v28  ;;  %1152 = verf.f32 %v644_v10  ;;  %v1565_v0 = vadd.f32 %v1475_v22, %v1345_v41 }
 0x171   :  { %v1141_v47 = vpop.eup %1140  ;;  %891 = vst [vmem:[#allocation7 + $0xc0] sm:$0xff] %v827_v45  ;;  %v766_v21 = vadd.f32 1.0, %v1139_v52  ;;  %v828_v19 = vmul.f32 %v764_v12, %v572_v6  ;;  %v575_v9 = vmul.f32 0.5, %v1471_v23  ;;  %1154 = verf.f32 %v646_v50 }
 0x172   :  { %v1561_v56 = vpop.f32.mrb[26].mxu0  ;;  %v767_v24 = vadd.f32 1.0, %v1141_v47  ;;  %893 = vst [vmem:[#allocation7 + $0xd0] sm:$0xff] %v829_v63  ;;  %v577_v61 = vmul.f32 0.5, %v1495_v53  ;;  %v647_v14 = vmul.f32 0.70710677, %v1555_v35  ;;  %v1581_v23 = vadd.f32 %v1479_v31, %v1347_v42 }
 0x173   :  { %v1567_v48 = vpop.f32.mrb[26].mxu1  ;;  %v1569_v62 = vpop.f32.mrb[27].mxu0  ;;  %v830_v54 = vmul.f32 %v766_v21, %v574_v18  ;;  %v649_v22 = vmul.f32 0.70710677, %v1559_v55  ;;  %892 = vst [vmem:[#allocation7 + $0xc8] sm:$0xff] %v828_v19  ;;  %v576_v17 = vmul.f32 0.5, %v1499_v25  ;;  %v1587_v27 = vadd.f32 %v1485_v44, %v1341_v39 }
 0x174   :  { %v1572_v3 = vpop.f32.mrb[27].mxu1  ;;  %v1143_v46 = vpop.eup %1142  ;;  %v831_v15 = vmul.f32 %v767_v24, %v575_v9  ;;  %v648_v59 = vmul.f32 0.70710677, %v1565_v0  ;;  %1156 = verf.f32 %v647_v14  ;;  %v1591_v29 = vadd.f32 %v1489_v2, %v1343_v40 }
 0x175   :  { %v1145_v60 = vpop.eup %1144  ;;  %894 = vst [vmem:[#allocation7 + $0xd8] sm:$0xff] %v830_v54  ;;  %v769_v53 = vadd.f32 1.0, %v1143_v46  ;;  %v578_v34 = vmul.f32 0.5, %v1505_v57  ;;  %1158 = verf.f32 %v649_v22  ;;  %v650_v37 = vmul.f32 0.70710677, %v1581_v23 }
 0x176   :  { %v1583_v26 = vpop.f32.mrb[28].mxu0  ;;  %v1147_v31 = vpop.eup %1146  ;;  %895 = vst [vmem:[#allocation7 + $0xe0] sm:$0xff] %v831_v15  ;;  %v768_v28 = vadd.f32 1.0, %v1145_v60  ;;  %v579_v2 = vmul.f32 0.5, %v1509_v58  ;;  %1160 = verf.f32 %v648_v59  ;;  %v651_v49 = vmul.f32 0.70710677, %v1587_v27 }
 0x177   :  { %v1593_v25 = vpop.f32.mrb[28].mxu1  ;;  %v1595_v32 = vpop.f32.mrb[29].mxu0  ;;  %v833_v38 = vmul.f32 %v769_v53, %v577_v61  ;;  %v770_v10 = vadd.f32 1.0, %v1147_v31  ;;  %1162 = verf.f32 %v650_v37  ;;  %v581_v50 = vmul.f32 0.5, %v1529_v20 }
 0x178   :  { %v1599_v6 = vpop.f32.mrb[29].mxu1  ;;  %v1149_v44 = vpop.eup %1148  ;;  %v832_v1 = vmul.f32 %v768_v28, %v576_v17  ;;  %v653_v52 = vmul.f32 0.70710677, %v1591_v29  ;;  %v1609_v12 = vadd.f32 %v1491_v51, %v1345_v41  ;;  %1164 = verf.f32 %v651_v49 }
 0x179   :  { %v771_v45 = vadd.f32 1.0, %v1149_v44  ;;  %897 = vst [vmem:[#allocation7 + $0xf0] sm:$0xff] %v833_v38  ;;  %v834_v57 = vmul.f32 %v770_v10, %v578_v34  ;;  %v1151_v63 = vpop.eup %1150  ;;  %v1617_v19 = vadd.f32 %v1501_v36, %v1347_v42  ;;  %v1621_v20 = vadd.f32 %v1513_v30, %v1341_v39 }
 0x17a   :  { %v1603_v18 = vpop.f32.mrb[30].mxu0  ;;  %896 = vst [vmem:[#allocation7 + $0xe8] sm:$0xff] %v832_v1  ;;  %v1153_v51 = vpop.eup %1152  ;;  %v773_v24 = vadd.f32 1.0, %v1151_v63  ;;  %v580_v54 = vmul.f32 0.5, %v1533_v4  ;;  %1166 = verf.f32 %v653_v52  ;;  %v652_v61 = vmul.f32 0.70710677, %v1609_v12 }
 0x17b   :  { %v1611_v47 = vpop.f32.mrb[30].mxu1  ;;  %v1613_v58 = vpop.f32.mrb[31].mxu0  ;;  %v835_v21 = vmul.f32 %v771_v45, %v579_v2  ;;  %898 = vst [vmem:[#allocation7 + $0xf8] sm:$0xff] %v834_v57  ;;  %v772_v22 = vadd.f32 1.0, %v1153_v51  ;;  %v582_v36 = vmul.f32 0.5, %v1537_v7  ;;  %v583_v46 = vmul.f32 0.5, %v1555_v35 }
 0x17c   :  { %v1623_v9 = vpop.f32.mrb[31].mxu1  ;;  %v1155_v14 = vpop.eup %1154  ;;  %v654_v30 = vmul.f32 0.70710677, %v1617_v19  ;;  %v837_v15 = vmul.f32 %v773_v24, %v581_v50  ;;  %1168 = verf.f32 %v652_v61  ;;  %v655_v59 = vmul.f32 0.70710677, %v1621_v20 }
 0x17d   :  { %899 = vst [vmem:[#allocation7 + $0x100] sm:$0xff] %v835_v21  ;;  %v774_v17 = vadd.f32 1.0, %v1155_v14  ;;  %v836_v60 = vmul.f32 %v772_v22, %v580_v54  ;;  %v1633_v4 = vadd.f32 %v1518_v11, %v1343_v40  ;;  %v1637_v53 = vadd.f32 %v1520_v13, %v1345_v41 }
 0x17e   :  { %1170 = verf.f32 %v654_v30  ;;  %v1157_v7 = vpop.eup %1156  ;;  %901 = vst [vmem:[#allocation7 + $0x110] sm:$0xff] %v837_v15  ;;  %v1641_v31 = vadd.f32 %v1524_v16, %v1347_v42  ;;  %v1645_v28 = vadd.f32 %v1539_v8, %v1341_v39  ;;  %v585_v37 = vmul.f32 0.5, %v1559_v55 }
 0x17f   :  { %v838_v35 = vmul.f32 %v774_v17, %v582_v36  ;;  %1172 = verf.f32 %v655_v59  ;;  %v1159_v34 = vpop.eup %1158  ;;  %900 = vst [vmem:[#allocation7 + $0x108] sm:$0xff] %v836_v60  ;;  %v775_v11 = vadd.f32 1.0, %v1157_v7  ;;  %v584_v13 = vmul.f32 0.5, %v1565_v0 }
 0x180   :  { %v657_v44 = vmul.f32 0.70710677, %v1633_v4  ;;  %v1161_v38 = vpop.eup %1160  ;;  %v777_v10 = vadd.f32 1.0, %v1159_v34  ;;  %v586_v2 = vmul.f32 0.5, %v1581_v23  ;;  %v656_v16 = vmul.f32 0.70710677, %v1637_v53 }
 0x181   :  { %902 = vst [vmem:[#allocation7 + $0x118] sm:$0xff] %v838_v35  ;;  %v658_v1 = vmul.f32 0.70710677, %v1641_v31  ;;  %v1163_v8 = vpop.eup %1162  ;;  %v839_v45 = vmul.f32 %v775_v11, %v583_v46  ;;  %v776_v49 = vadd.f32 1.0, %v1161_v38  ;;  %v587_v57 = vmul.f32 0.5, %v1587_v27 }
 0x182   :  { %1174 = verf.f32 %v657_v44  ;;  %v841_v55 = vmul.f32 %v777_v10, %v585_v37  ;;  %v778_v50 = vadd.f32 1.0, %v1163_v8  ;;  %v659_v0 = vmul.f32 0.70710677, %v1645_v28  ;;  %v1165_v52 = vpop.eup %1164 }
 0x183   :  { %1176 = verf.f32 %v656_v16  ;;  %903 = vst [vmem:[#allocation7 + $0x120] sm:$0xff] %v839_v45  ;;  %v840_v63 = vmul.f32 %v776_v49, %v584_v13  ;;  %v1657_v23 = vadd.f32 %v1542_v5, %v1343_v40  ;;  %v1661_v21 = vadd.f32 %v1544_v33, %v1345_v41 }
 0x184   :  { %1178 = verf.f32 %v658_v1  ;;  %v1167_v51 = vpop.eup %1166  ;;  %905 = vst [vmem:[#allocation7 + $0x130] sm:$0xff] %v841_v55  ;;  %v842_v27 = vmul.f32 %v778_v50, %v586_v2  ;;  %v779_v24 = vadd.f32 1.0, %v1165_v52  ;;  %v1665_v54 = vadd.f32 %v1549_v43, %v1347_v42 }
 0x185   :  { %1180 = verf.f32 %v659_v0  ;;  %904 = vst [vmem:[#allocation7 + $0x128] sm:$0xff] %v840_v63  ;;  %v589_v61 = vmul.f32 0.5, %v1591_v29  ;;  %v781_v14 = vadd.f32 1.0, %v1167_v51  ;;  %v588_v5 = vmul.f32 0.5, %v1609_v12 }
 0x186   :  { %v661_v22 = vmul.f32 0.70710677, %v1657_v23  ;;  %v1169_v36 = vpop.eup %1168  ;;  %906 = vst [vmem:[#allocation7 + $0x138] sm:$0xff] %v842_v27  ;;  %v843_v33 = vmul.f32 %v779_v24, %v587_v57  ;;  %v590_v46 = vmul.f32 0.5, %v1617_v19  ;;  %v660_v30 = vmul.f32 0.70710677, %v1661_v21 }
 0x187   :  { %v662_v15 = vmul.f32 0.70710677, %v1665_v54  ;;  %v845_v43 = vmul.f32 %v781_v14, %v589_v61  ;;  %v780_v59 = vadd.f32 1.0, %v1169_v36  ;;  %v1675_v29 = vadd.f32 %v1561_v56, %v1341_v39 }
 0x188   :  { %v1171_v17 = vpop.eup %1170  ;;  %1182 = verf.f32 %v661_v22  ;;  %907 = vst [vmem:[#allocation7 + $0x140] sm:$0xff] %v843_v33  ;;  %v1679_v7 = vadd.f32 %v1567_v48, %v1343_v40  ;;  %v1683_v19 = vadd.f32 %v1569_v62, %v1345_v41  ;;  %v591_v34 = vmul.f32 0.5, %v1621_v20 }
 0x189   :  { %v1173_v12 = vpop.eup %1172  ;;  %v782_v60 = vadd.f32 1.0, %v1171_v17  ;;  %1184 = verf.f32 %v660_v30  ;;  %909 = vst [vmem:[#allocation7 + $0x150] sm:$0xff] %v845_v43  ;;  %v844_v35 = vmul.f32 %v780_v59, %v588_v5  ;;  %v593_v37 = vmul.f32 0.5, %v1633_v4 }
 0x18a   :  { %v783_v11 = vadd.f32 1.0, %v1173_v12  ;;  %1186 = verf.f32 %v662_v15  ;;  %v663_v13 = vmul.f32 0.70710677, %v1675_v29  ;;  %v665_v44 = vmul.f32 0.70710677, %v1679_v7 }
 0x18b   :  { %v846_v56 = vmul.f32 %v782_v60, %v590_v46  ;;  %908 = vst [vmem:[#allocation7 + $0x148] sm:$0xff] %v844_v35  ;;  %v592_v10 = vmul.f32 0.5, %v1637_v53  ;;  %v664_v62 = vmul.f32 0.70710677, %v1683_v19  ;;  %v1693_v2 = vadd.f32 %v1572_v3, %v1347_v42 }
 0x18c   :  { %v1175_v38 = vpop.eup %1174  ;;  %v847_v48 = vmul.f32 %v783_v11, %v591_v34  ;;  %1188 = verf.f32 %v663_v13  ;;  %v1697_v4 = vadd.f32 %v1583_v26, %v1341_v39  ;;  %v1701_v1 = vadd.f32 %v1593_v25, %v1343_v40 }
 0x18d   :  { %v1177_v20 = vpop.eup %1176  ;;  %910 = vst [vmem:[#allocation7 + $0x158] sm:$0xff] %v846_v56  ;;  %v785_v16 = vadd.f32 1.0, %v1175_v38  ;;  %v594_v45 = vmul.f32 0.5, %v1641_v31  ;;  %1190 = verf.f32 %v665_v44  ;;  %v666_v3 = vmul.f32 0.70710677, %v1693_v2 }
 0x18e   :  { %v1179_v8 = vpop.eup %1178  ;;  %911 = vst [vmem:[#allocation7 + $0x160] sm:$0xff] %v847_v48  ;;  %v784_v53 = vadd.f32 1.0, %v1177_v20  ;;  %v595_v50 = vmul.f32 0.5, %v1645_v28  ;;  %1192 = verf.f32 %v664_v62  ;;  %v667_v25 = vmul.f32 0.70710677, %v1697_v4 }
 0x18f   :  { %v1181_v49 = vpop.eup %1180  ;;  %v849_v57 = vmul.f32 %v785_v16, %v593_v37  ;;  %v786_v55 = vadd.f32 1.0, %v1179_v8  ;;  %1194 = verf.f32 %v666_v3  ;;  %v669_v63 = vmul.f32 0.70710677, %v1701_v1 }
 0x190   :  { %v848_v26 = vmul.f32 %v784_v53, %v592_v10  ;;  %v787_v0 = vadd.f32 1.0, %v1181_v49  ;;  %v1710_v31 = vadd.f32 %v1595_v32, %v1345_v41  ;;  %1196 = verf.f32 %v667_v25 }
 0x191   :  { %913 = vst [vmem:[#allocation7 + $0x170] sm:$0xff] %v849_v57  ;;  %v850_v52 = vmul.f32 %v786_v55, %v594_v45  ;;  %v1714_v28 = vadd.f32 %v1599_v6, %v1347_v42  ;;  %v1718_v24 = vadd.f32 %v1603_v18, %v1341_v39  ;;  %v597_v14 = vmul.f32 0.5, %v1657_v23 }
 0x192   :  { %v1183_v51 = vpop.eup %1182  ;;  %912 = vst [vmem:[#allocation7 + $0x168] sm:$0xff] %v848_v26  ;;  %v851_v27 = vmul.f32 %v787_v0, %v595_v50  ;;  %1198 = verf.f32 %v669_v63  ;;  %v668_v32 = vmul.f32 0.70710677, %v1710_v31  ;;  %v596_v36 = vmul.f32 0.5, %v1661_v21 }
 0x193   :  { %v1185_v61 = vpop.eup %1184  ;;  %914 = vst [vmem:[#allocation7 + $0x178] sm:$0xff] %v850_v52  ;;  %v789_v5 = vadd.f32 1.0, %v1183_v51  ;;  %v598_v6 = vmul.f32 0.5, %v1665_v54  ;;  %v670_v46 = vmul.f32 0.70710677, %v1714_v28  ;;  %v543_v23 = vadd.f32 %v1611_v47, %v1343_v40 }
 0x194   :  { %v1187_v22 = vpop.eup %1186  ;;  %915 = vst [vmem:[#allocation7 + $0x180] sm:$0xff] %v851_v27  ;;  %v788_v33 = vadd.f32 1.0, %v1185_v61  ;;  %1200 = verf.f32 %v668_v32  ;;  %v671_v18 = vmul.f32 0.70710677, %v1718_v24  ;;  %v384_v17 = vadd.f32 %v1613_v58, %v1345_v41 }
 0x195   :  { %v853_v30 = vmul.f32 %v789_v5, %v597_v14  ;;  %v790_v39 = vadd.f32 1.0, %v1187_v22  ;;  %1202 = verf.f32 %v670_v46  ;;  %v1732_v54 = vadd.f32 %v1623_v9, %v1347_v42 }
 0x196   :  { %v852_v15 = vmul.f32 %v788_v33, %v596_v36  ;;  %v1189_v43 = vpop.eup %1188  ;;  %1204 = verf.f32 %v671_v18  ;;  %v599_v12 = vmul.f32 0.5, %v1675_v29  ;;  %v673_v35 = vmul.f32 0.70710677, %v543_v23 }
 0x197   :  { %917 = vst [vmem:[#allocation7 + $0x190] sm:$0xff] %v853_v30  ;;  %v854_v21 = vmul.f32 %v790_v39, %v598_v6  ;;  %v1191_v59 = vpop.eup %1190  ;;  %v791_v60 = vadd.f32 1.0, %v1189_v43  ;;  %v601_v40 = vmul.f32 0.5, %v1679_v7  ;;  %v672_v41 = vmul.f32 0.70710677, %v384_v17 }
 0x198   :  { %916 = vst [vmem:[#allocation7 + $0x188] sm:$0xff] %v852_v15  ;;  %v1193_v34 = vpop.eup %1192  ;;  %v793_v47 = vadd.f32 1.0, %v1191_v59  ;;  %v674_v58 = vmul.f32 0.70710677, %v1732_v54  ;;  %v600_v37 = vmul.f32 0.5, %v1683_v19  ;;  %1206 = verf.f32 %v673_v35 }
 0x199   :  { %918 = vst [vmem:[#allocation7 + $0x198] sm:$0xff] %v854_v21  ;;  %v1195_v11 = vpop.eup %1194  ;;  %v855_v56 = vmul.f32 %v791_v60, %v599_v12  ;;  %v792_v42 = vadd.f32 1.0, %v1193_v34  ;;  %v602_v13 = vmul.f32 0.5, %v1693_v2  ;;  %1208 = verf.f32 %v672_v41 }
 0x19a   :  { %v857_v9 = vmul.f32 %v793_v47, %v601_v40  ;;  %v794_v29 = vadd.f32 1.0, %v1195_v11  ;;  %v1197_v44 = vpop.eup %1196  ;;  %1210 = verf.f32 %v674_v58  ;;  %v603_v10 = vmul.f32 0.5, %v1697_v4 }
 0x19b   :  { %919 = vst [vmem:[#allocation7 + $0x1a0] sm:$0xff] %v855_v56  ;;  %v856_v38 = vmul.f32 %v792_v42, %v600_v37  ;;  %v795_v62 = vadd.f32 1.0, %v1197_v44  ;;  %v605_v19 = vmul.f32 0.5, %v1701_v1  ;;  %v604_v45 = vmul.f32 0.5, %v1710_v31 }
 0x19c   :  { %v1199_v7 = vpop.eup %1198  ;;  %921 = vst [vmem:[#allocation7 + $0x1b0] sm:$0xff] %v857_v9  ;;  %v858_v48 = vmul.f32 %v794_v29, %v602_v13  ;;  %v606_v57 = vmul.f32 0.5, %v1714_v28  ;;  %v607_v50 = vmul.f32 0.5, %v1718_v24  ;;  %v609_v63 = vmul.f32 0.5, %v543_v23 }
 0x19d   :  { %920 = vst [vmem:[#allocation7 + $0x1a8] sm:$0xff] %v856_v38  ;;  %v797_v20 = vadd.f32 1.0, %v1199_v7  ;;  %v859_v8 = vmul.f32 %v795_v62, %v603_v10  ;;  %v608_v27 = vmul.f32 0.5, %v384_v17  ;;  %v610_v14 = vmul.f32 0.5, %v1732_v54 }
 0x19e   :  { %v1201_v16 = vpop.eup %1200  ;;  %922 = vst [vmem:[#allocation7 + $0x1b8] sm:$0xff] %v858_v48 }
 0x19f   :  { %v1203_v2 = vpop.eup %1202  ;;  %v861_v53 = vmul.f32 %v797_v20, %v605_v19  ;;  %v796_v3 = vadd.f32 1.0, %v1201_v16  ;;  %923 = vst [vmem:[#allocation7 + $0x1c0] sm:$0xff] %v859_v8 }
 0x1a0   :  { %v1205_v49 = vpop.eup %1204  ;;  %v798_v55 = vadd.f32 1.0, %v1203_v2 }
 0x1a1   :  { %925 = vst [vmem:[#allocation7 + $0x1d0] sm:$0xff] %v861_v53  ;;  %v860_v4 = vmul.f32 %v796_v3, %v604_v45  ;;  %v799_v26 = vadd.f32 1.0, %v1205_v49 }
 0x1a2   :  { %v862_v1 = vmul.f32 %v798_v55, %v606_v57  ;;  %v1207_v0 = vpop.eup %1206 }
 0x1a3   :  { %924 = vst [vmem:[#allocation7 + $0x1c8] sm:$0xff] %v860_v4  ;;  %v863_v25 = vmul.f32 %v799_v26, %v607_v50  ;;  %v1209_v52 = vpop.eup %1208  ;;  %v801_v51 = vadd.f32 1.0, %v1207_v0 }
 0x1a4   :  { %926 = vst [vmem:[#allocation7 + $0x1d8] sm:$0xff] %v862_v1  ;;  %v1211_v31 = vpop.eup %1210  ;;  %v800_v61 = vadd.f32 1.0, %v1209_v52 }
 0x1a5   :  { %927 = vst [vmem:[#allocation7 + $0x1e0] sm:$0xff] %v863_v25  ;;  %v865_v28 = vmul.f32 %v801_v51, %v609_v63  ;;  %v802_v5 = vadd.f32 1.0, %v1211_v31 }
 0x1a6   :  { %v864_v24 = vmul.f32 %v800_v61, %v608_v27 }
 0x1a7   :  { %929 = vst [vmem:[#allocation7 + $0x1f0] sm:$0xff] %v865_v28  ;;  %v866_v32 = vmul.f32 %v802_v5, %v610_v14 }
 0x1a8   :  { %928 = vst [vmem:[#allocation7 + $0x1e8] sm:$0xff] %v864_v24 }
 0x1a9   :  { %930 = vst [vmem:[#allocation7 + $0x1f8] sm:$0xff] %v866_v32 }
 0x1aa   :  { %1267 = shalt.err (!%p1264_p6)
}
 0x1ab   :  { %s1268_s17 = scalar_lea.hbm %s1763_s3, 8192 }
 0x1ac   :  { %p1269_p7 = scmp.ne.s32.totalorder %s1763_s3, %s1268_s17  ;;  %p1272_p8 = scmp.lt.u32.totalorder %s1268_s17, %s1763_s3 }
 0x1ae   :  { %p1274_p9 = pnand %p1272_p8, %p1269_p7 }
 0x1b0   :  { %1277 = shalt.err (!%p1274_p9)
}
 0x1b1   :  { %942 = dma.vmem_to_hbm [thread:$0]  %s937_s13, 8192, %s1763_s3, [#allocation4], %s1288_s0, %s1288_s0, %s1289_s9  }
 0x1b2   :  { %1282 = dma.done.wait [#allocation4], 8192  }
 0x1b3   :  { %1283 = vsyncadd [#allocation4], 4294959104 }
 0x1b4   :  { %946 = vsyncpa [#allocation3], 1 }
 0x1b5   :  { %947 = vsyncpa [#allocation6], 1 }
 0x1b6   :  { %948 = vsyncpa [#allocation4], 1 }

</bundles_post_ra>
